<compile_context>
chip_gen: v7x
topology: tpu7x:2x2x1
jax: 0.10.0
libtpu: 0.0.40
codegen_flags: <defaults>
</compile_context>

<pallas_src>
import jax
import jax.numpy as jnp
from jax.experimental import pallas as pl
from jax.experimental.pallas import tpu as pltpu


_BLOCK_ROWS = 2048   # rows of 128 samples per grid step (multiple of 8)
_LANES = 128
_ROW_ELEMS = 3 * _LANES   # 384 interleaved f32 per row of 128 samples


def _linear_kernel(b_ref, wpat_ref, sel_ref, x_ref, o_ref):
    """o[r, j] = sum_k w_k * x[128*row0 + 128*r + j, k] + b

    b_ref   : SMEM (1,)       f32   bias
    wpat_ref: VMEM (1, 384)   f32   [w0, w1, w2, w0, w1, w2, ...]
    sel_ref : VMEM (384, 128) bf16  sel[l, j] = 1.0 iff l // 3 == j
    x_ref   : VMEM (R, 384)   f32   native interleaved bytes of 128*R samples
    o_ref   : VMEM (R, 128)   f32   dense, unmasked stores
    """
    # Apply weights lane-wise in exact f32 (VPU).
    xw = x_ref[...] * wpat_ref[...]

    # Error-free bf16x3 split of the weighted stream (exact: xw = hi+mid+lo).
    hi = xw.astype(jnp.bfloat16)
    r1 = xw - hi.astype(jnp.float32)
    mid = r1.astype(jnp.bfloat16)
    lo = (r1 - mid.astype(jnp.float32)).astype(jnp.bfloat16)

    # De-interleave + sum-of-3 via the MXU: products with the 0/1 selection
    # matrix are exact, accumulation is f32 -> full f32 accuracy.
    sel = sel_ref[...]
    acc = jnp.dot(hi, sel, preferred_element_type=jnp.float32)
    acc = acc + jnp.dot(mid, sel, preferred_element_type=jnp.float32)
    acc = acc + jnp.dot(lo, sel, preferred_element_type=jnp.float32)

    o_ref[...] = acc + b_ref[0]


def _linear_forward_pallas(x2d, w, b, *, block_rows=_BLOCK_ROWS):
    """x2d: (B, 3) f32 with B % 128 == 0.  Returns (B, 1) f32."""
    B, K = x2d.shape
    assert K == 3 and B % _LANES == 0
    assert block_rows % 8 == 0

    n_rows = B // _LANES
    # Free reshape of the native row-major bytes: no transpose, no pad, no copy.
    xb = x2d.astype(jnp.float32).reshape(n_rows, _ROW_ELEMS)

    # Tiny resident operands (loaded into VMEM once; constant index_map).
    wpat = jnp.tile(w.astype(jnp.float32), _LANES).reshape(1, _ROW_ELEMS)
    sel = (jnp.arange(_ROW_ELEMS, dtype=jnp.int32)[:, None] // 3
           == jnp.arange(_LANES, dtype=jnp.int32)[None, :]).astype(jnp.bfloat16)
    b_arr = b.reshape(1).astype(jnp.float32)

    # Block size: full array if it fits in one block (legal regardless of the
    # /8 rule since it equals the full dim), else a multiple-of-8 block with a
    # partial (masked-write) last block -> no padded copies anywhere.
    br = n_rows if n_rows <= block_rows else block_rows
    n_blocks = pl.cdiv(n_rows, br)

    out = pl.pallas_call(
        _linear_kernel,
        out_shape=jax.ShapeDtypeStruct((n_rows, _LANES), jnp.float32),
        grid=(n_blocks,),
        in_specs=[
            pl.BlockSpec(memory_space=pltpu.MemorySpace.SMEM),      # bias (1,)
            pl.BlockSpec((1, _ROW_ELEMS), lambda i: (0, 0)),        # wpat
            pl.BlockSpec((_ROW_ELEMS, _LANES), lambda i: (0, 0)),   # selection
            pl.BlockSpec((br, _ROW_ELEMS), lambda i: (i, 0)),       # x block
        ],
        out_specs=pl.BlockSpec((br, _LANES), lambda i: (i, 0)),
        compiler_params=pltpu.CompilerParams(
            dimension_semantics=("parallel",),   # megacore sharding on v7x
        ),
    )(b_arr, wpat, sel, xb)

    return out.reshape(B, 1)   # free reshape: same contiguous bytes


def _exact_linear_xla(x, w, b):
    """Exact f32 y = x @ W^T + b as a single fused elementwise XLA pass."""
    x = x.astype(jnp.float32)
    return x[:, 0:1] * w[0] + x[:, 1:2] * w[1] + x[:, 2:3] * w[2] + b[0]


def linear_forward(x, weight, bias, *, block_rows=_BLOCK_ROWS,
                   min_pallas_batch=1024, force_pallas=False):
    """Pallas equivalent of MultivariateLinearRegressionModel.forward.

    x: (B, 3) f32, weight: (1, 3) f32 (PyTorch layout), bias: (1,) f32.
    Returns (B, 1) f32.
    """
    B = x.shape[0]
    w = weight.reshape(3).astype(jnp.float32)
    b = jnp.asarray(bias).reshape(1).astype(jnp.float32)

    if B < _LANES or (not force_pallas and B < min_pallas_batch):
        # For tiny batches the fixed pallas_call overhead dwarfs the ~16*B
        # bytes of useful work; a fused one-pass XLA expression is optimal.
        return _exact_linear_xla(x, w, b)

    B_main = (B // _LANES) * _LANES
    # Note: when B % 128 != 0 the leading slice may materialize one extra copy
    # of the bulk; batches that are multiples of 128 take the zero-copy path.
    x_main = x if B_main == B else x[:B_main]
    y_main = _linear_forward_pallas(x_main, w, b, block_rows=block_rows)
    if B_main == B:
        return y_main
    y_tail = _exact_linear_xla(x[B_main:], w, b)   # < 128 rows, negligible
    return jnp.concatenate([y_main, y_tail], axis=0)


if __name__ == "__main__":
    key = jax.random.PRNGKey(0)
    kx1, kx2, kw, kb = jax.random.split(key, 4)

    weight = jax.random.normal(kw, (1, 3), dtype=jnp.float32) * 0.5
    bias = jax.random.normal(kb, (1,), dtype=jnp.float32) * 0.1

    def reference(x):
        # Exact f32 reference (same semantics as PyTorch nn.Linear(3, 1)).
        return (x[:, 0:1] * weight[0, 0] + x[:, 1:2] * weight[0, 1]
                + x[:, 2:3] * weight[0, 2] + bias[0])

    # Case 1: ragged batch (13 full rows-of-128 + 37 tail samples) with a small
    # block_rows to exercise a multi-step grid and a partial last block.
    B1 = 1701
    x1 = jax.random.normal(kx1, (B1, 3), dtype=jnp.float32)
    y1 = jax.block_until_ready(
        linear_forward(x1, weight, bias, block_rows=8, force_pallas=True))
    assert y1.shape == (B1, 1)
    assert jnp.allclose(y1, reference(x1), atol=1e-5, rtol=1e-5)

    # Case 2: multiple-of-128 batch -> zero-copy single-block fast path.
    B2 = 2048
    x2 = jax.random.normal(kx2, (B2, 3), dtype=jnp.float32)
    y2 = jax.block_until_ready(linear_forward(x2, weight, bias, force_pallas=True))
    assert y2.shape == (B2, 1)
    assert jnp.allclose(y2, reference(x2), atol=1e-5, rtol=1e-5)

    # Case 3: tiny batch (like the PyTorch B=8 demo) -> fused XLA dispatch path.
    y3 = jax.block_until_ready(linear_forward(x1[:8], weight, bias))
    assert y3.shape == (8, 1)
    assert jnp.allclose(y3, reference(x1[:8]), atol=1e-5, rtol=1e-5)

    print("KERNEL_OK")
</pallas_src>

<mosaic_0001>
module attributes {stable_mosaic.version = 11 : i64} {
  func.func @_linear_kernel(%arg0: i32, %arg1: memref<1xf32, #tpu.memory_space<smem>>, %arg2: memref<1x384xf32, #tpu.memory_space<vmem>>, %arg3: memref<384x128xbf16, #tpu.memory_space<vmem>>, %arg4: memref<8x384xf32, #tpu.memory_space<vmem>>, %arg5: memref<8x128xf32, #tpu.memory_space<vmem>>) attributes {dimension_semantics = [#tpu.dimension_semantics<parallel>], iteration_bounds = array<i64: 2>, scalar_prefetch = 0 : i64, scratch_operands = 0 : i64, tpu.core_type = #tpu.core_type<tc>, window_params = [{transform_indices = @transform_0, window_bounds = array<i64: 1>}, {pipeline_mode = #tpu.pipeline_mode<synchronous>, transform_indices = @transform_1, window_bounds = array<i64: 1, 384>}, {pipeline_mode = #tpu.pipeline_mode<synchronous>, transform_indices = @transform_2, window_bounds = array<i64: 384, 128>}, {transform_indices = @transform_3, window_bounds = array<i64: 8, 384>}, {transform_indices = @transform_4, window_bounds = array<i64: 8, 128>}]} {
    %c0 = arith.constant 0 : index
    %c0_0 = arith.constant 0 : index
    %0 = vector.load %arg4[%c0, %c0_0] : memref<8x384xf32, #tpu.memory_space<vmem>>, vector<8x384xf32>
    %c0_1 = arith.constant 0 : index
    %c0_2 = arith.constant 0 : index
    %1 = vector.load %arg2[%c0_1, %c0_2] : memref<1x384xf32, #tpu.memory_space<vmem>>, vector<1x384xf32>
    %2 = vector.broadcast %1 : vector<1x384xf32> to vector<8x384xf32>
    %3 = arith.mulf %0, %2 : vector<8x384xf32>
    %4 = arith.truncf %3 : vector<8x384xf32> to vector<8x384xbf16>
    %5 = arith.extf %4 : vector<8x384xbf16> to vector<8x384xf32>
    %6 = arith.subf %3, %5 : vector<8x384xf32>
    %7 = arith.truncf %6 : vector<8x384xf32> to vector<8x384xbf16>
    %8 = arith.extf %7 : vector<8x384xbf16> to vector<8x384xf32>
    %9 = arith.subf %6, %8 : vector<8x384xf32>
    %10 = arith.truncf %9 : vector<8x384xf32> to vector<8x384xbf16>
    %c0_3 = arith.constant 0 : index
    %c0_4 = arith.constant 0 : index
    %11 = vector.load %arg3[%c0_3, %c0_4] : memref<384x128xbf16, #tpu.memory_space<vmem>>, vector<384x128xbf16>
    %cst = arith.constant dense<0.000000e+00> : vector<8x128xf32>
    %12 = tpu.matmul %4, %11, %cst {dimension_numbers = #tpu.dot_dimension_numbers<[1], [0], [0], [1], [0, 0, 1, 1], [], []>} : vector<8x384xbf16>, vector<384x128xbf16>, vector<8x128xf32> -> vector<8x128xf32>
    %cst_5 = arith.constant dense<0.000000e+00> : vector<8x128xf32>
    %13 = tpu.matmul %7, %11, %cst_5 {dimension_numbers = #tpu.dot_dimension_numbers<[1], [0], [0], [1], [0, 0, 1, 1], [], []>} : vector<8x384xbf16>, vector<384x128xbf16>, vector<8x128xf32> -> vector<8x128xf32>
    %14 = arith.addf %12, %13 : vector<8x128xf32>
    %cst_6 = arith.constant dense<0.000000e+00> : vector<8x128xf32>
    %15 = tpu.matmul %10, %11, %cst_6 {dimension_numbers = #tpu.dot_dimension_numbers<[1], [0], [0], [1], [0, 0, 1, 1], [], []>} : vector<8x384xbf16>, vector<384x128xbf16>, vector<8x128xf32> -> vector<8x128xf32>
    %16 = arith.addf %14, %15 : vector<8x128xf32>
    %c0_7 = arith.constant 0 : index
    %17 = memref.load %arg1[%c0_7] : memref<1xf32, #tpu.memory_space<smem>>
    %18 = vector.broadcast %17 : f32 to vector<8x128xf32>
    %19 = arith.addf %16, %18 : vector<8x128xf32>
    %c0_8 = arith.constant 0 : index
    %c0_9 = arith.constant 0 : index
    %20 = vector.load %arg5[%c0_8, %c0_9] : memref<8x128xf32, #tpu.memory_space<vmem>>, vector<8x128xf32>
    tpu.vector_store %arg5[%c0_8, %c0_9], %19 {strides = array<i32>} : memref<8x128xf32, #tpu.memory_space<vmem>>, vector<8x128xf32>,
    return
  }
  func.func @transform_0(%arg0: i32) -> i32 {
    %c0_i32 = arith.constant 0 : i32
    %c0_i32_0 = arith.constant 0 : i32
    return %c0_i32 : i32
  }
  func.func @transform_1(%arg0: i32) -> (i32, i32) {
    %c0_i32 = arith.constant 0 : i32
    %c0_i32_0 = arith.constant 0 : i32
    %c0_i32_1 = arith.constant 0 : i32
    return %c0_i32, %c0_i32_0 : i32, i32
  }
  func.func @transform_2(%arg0: i32) -> (i32, i32) {
    %c0_i32 = arith.constant 0 : i32
    %c0_i32_0 = arith.constant 0 : i32
    %c0_i32_1 = arith.constant 0 : i32
    return %c0_i32, %c0_i32_0 : i32, i32
  }
  func.func @transform_3(%arg0: i32) -> (i32, i32) {
    %c0_i32 = arith.constant 0 : i32
    %c0_i32_0 = arith.constant 0 : i32
    return %arg0, %c0_i32 : i32, i32
  }
  func.func @transform_4(%arg0: i32) -> (i32, i32) {
    %c0_i32 = arith.constant 0 : i32
    %c0_i32_0 = arith.constant 0 : i32
    return %arg0, %c0_i32 : i32, i32
  }
}

</mosaic_0001>

<bundles_post_ra>
// kernel: tpu_custom_call.1
= control target key start
LH: loop header
LB: loop body
LE: loop exit
PB: predicated region body
PF: predicated region fallthrough
CT: control target
= control target key end

     0   :  { %s1623_s0 = inlined_call_operand.<no memory space> [shape: f32[1], index: 0, kind: input, shape index: {}]   ;;  %s1624_s1 = inlined_call_operand.vmem [shape: f32[1,384], index: 1, kind: input, shape index: {}]   ;;  %s1625_s2 = inlined_call_operand.hbm [shape: bf16[384,128], index: 2, kind: input, shape index: {}]   ;;  %s1626_s3 = inlined_call_operand.hbm [shape: f32[13,384], index: 3, kind: input, shape index: {}]   ;;  %s1627_s4 = inlined_call_operand.hbm [shape: f32[13,128], index: 4, kind: output, shape index: {}]  }
   0x1   :  { %9 = sst [smem:[#allocation2]] %s1623_s0 }
   0x2   :  { %10 = vsyncpa [#allocation4], 0 }
   0x3   :  { %11 = vsyncpa [#allocation7], 0 }
   0x4   :  { %13 = vsyncpa [#allocation7 + $0x1], 0 }
   0x5   :  { %14 = vsyncpa [#allocation5], 0 }
   0x6   :  { %16 = vsyncpa [#allocation5 + $0x1], 0  ;;  %s1250_s17 = smov 0   ;;  %s1252_s18 = smov 0  }
   0x7   :  { %s1254_s19 = smov 0   ;;  %s1256_s20 = smov 0  }
   0x8 LB: > { %s1271_s0 = sadd.s32 4294967295, %s1213_s20   ;;  %s808_s21 = sadd.s32 4294967294, %s1213_s20   ;;  %s1213_s20 = sphi %s1256_s20, %s1647_s20   ;;  %s1209_s19 = sphi %s1254_s19, %s1646_s19   ;;  %s1205_s18 = sphi %s1252_s18, %s1645_s18   ;;  %s1201_s17 = sphi %s1250_s17, %s1644_s17  }
   0x9   : > { %p105_p0 = scmp.ne.s32.totalorder %s1205_s18, %s1201_s17  ;;  %p1628_p1 = scmp.eq.s32.totalorder %s1271_s0, 0 }
   0xa   : > { %p135_p3 = scmp.eq.s32.totalorder %s808_s21, 1  ;;  %p809_p5 = scmp.ge.s32.totalorder %s1213_s20, 1 }
   0xb   : > { %p1280_p4 = por %p1628_p1, %p105_p0  ;;  %p142_p7 = scmp.lt.s32.totalorder %s1213_s20, 3 }
   0xc   : > { %p1285_p6 = por %p135_p3, %p105_p0  ;;  %s1215_s25 = smov [#allocation3]  }
   0xd   : > { %s1631_s22 = scalar_select %p1280_p4, 1, 0 }
   0xe   : > { %s1632_s23 = scalar_select %p1285_p6, 1, 0 }
   0xf   : > { %p1290_p8 = pnand %p809_p5, %p142_p7  ;;  %s160_s26 = sshll.u32 %s1215_s25, 4  ;;  %s1294_s26 = int_to_ptr.vmem [resolvable:$true] %s160_s26 }
  0x10   : > { %s1306_s28 = sadd.s32 1, %s1213_s20   ;;  %s92_s29 = sadd.s32 1, %s1209_s19 }
  0x11   : > { %s1633_s24 = scalar_select %p1290_p8, 1, 0 }
  0x12   : > { %p1008_p9 = pneg %p1290_p8  ;;  %s89_s30 = ssub.s32 %s1213_s20, %s1306_s28 }
  0x13   : > { %s1085_s7 = scalar_lea.hbm %s1625_s2, 3072 }
  0x14   : > { %p1301_p11 = pnand %p1008_p9, %p1628_p1  ;;  %p1086_p12 = scmp.ne.s32.totalorder %s1625_s2, %s1085_s7 }
  0x15   : > { %p1092_p5 = scmp.lt.u32.totalorder %s1085_s7, %s1625_s2 }
  0x16   : > { %p1087_p13 = pneg %p1301_p11 }
  0x18   : > { %p1088_p0 = pnand %p1087_p13, %p1086_p12 }
  0x1a   : > { %p1089_p3 = pneg %p1088_p0 }
  0x1c   : > { %p1094_p7 = pnand %p1092_p5, %p1089_p3 }
  0x1e   : > { %1097 = shalt.err (!%p1094_p7)
}
  0x1f   : > { %s1098_s12 = scalar_lea.vmem %s1294_s26, 3072  ;;  %p1106_p2 = scmp.lt.s32.totalorder %s1294_s26, %s1294_s26 }
  0x20   : > { %p1099_p9 = scmp.ne.s32.totalorder %s1294_s26, %s1098_s12  ;;  %p1107_p6 = scmp.lt.s32.totalorder %s1098_s12, %s1098_s12 }
  0x22   : > { %p1101_p10 = pnand %p1099_p9, %p1087_p13  ;;  %p1108_p4 = por %p1107_p6, %p1106_p2 }
  0x24   : > { %p1102_p1 = pneg %p1101_p10 }
  0x26   : > { %p1109_p8 = pnand %p1108_p4, %p1102_p1 }
  0x28   : > { %1112 = shalt.err (!%p1109_p8)
}
  0x29   : > { %s1216_s13 = smov 64   ;;  %s1217_s14 = smov 4  }
  0x2a   : > { %1011 = dma.hbm_to_vmem [thread:$0]  (!%p1301_p11), %s1625_s2, 3072, %s1294_s26, [#allocation4], %s1216_s13, %s1216_s13, %s1217_s14  }
  0x2b   : > { %p90_p2 = scmp.eq.s32.totalorder %s89_s30, 0  ;;  %p99_p1 = scmp.ne.s32.totalorder %s1209_s19, %s1205_s18 }
  0x2c   : > { %p100_p4 = scmp.eq.s32.totalorder %s1213_s20, 0  ;;  %p1021_p6 = scmp.lt.s32.totalorder %s1213_s20, 2 }
  0x2d   : > { %s1337_s21 = scalar_select %p90_p2, %s1209_s19, %s92_s29  }
  0x2e   : > { %p101_p8 = por %p100_p4, %p99_p1  ;;  %p1635_p10 = scmp.eq.s32.totalorder %s1271_s0, 1 }
  0x2f   : > { %s174_s5 = sand.u32 1, %s1209_s19   ;;  %s998_s6 = smul.u32 384, %s1213_s20 }
  0x30   : > { %p1341_p12 = por %p1635_p10, %p99_p1  ;;  %s997_s7 = smul.u32 24, %s174_s5 }
  0x31   : > { %p1347_p13 = pnand %p1021_p6, %p101_p8  ;;  %s1354_s29 = scalar_lea.hbm %s1626_s3, %s998_s6 }
  0x32   : > { %s178_s8 = scalar_lea.vmem [#allocation6], %s997_s7  ;;  %s175_s10 = scalar_lea.sflag [#allocation7], %s174_s5 }
  0x33   : > { %s186_s9 = sshll.u32 %s178_s8, 4  ;;  %s1113_s11 = scalar_lea.hbm %s1354_s29, 384  ;;  %s1356_s9 = int_to_ptr.vmem [resolvable:$true] %s186_s9 }
  0x34   : > { %p1114_p11 = scmp.ne.s32.totalorder %s1354_s29, %s1113_s11  ;;  %p1115_p0 = pneg %p1347_p13 }
  0x35   : > { %s1118_s14 = scalar_lea.hbm %s1626_s3, 768  ;;  %p1119_p7 = scmp.lt.u32.totalorder %s1354_s29, %s1626_s3 }
  0x36   : > { %p1116_p3 = pnand %p1115_p0, %p1114_p11  ;;  %p1120_p9 = scmp.lt.u32.totalorder %s1118_s14, %s1113_s11 }
  0x37   : > { %p1122_p1 = scmp.lt.u32.totalorder %s1113_s11, %s1354_s29 }
  0x38   : > { %p1117_p5 = pneg %p1116_p3  ;;  %p1121_p2 = por %p1120_p9, %p1119_p7 }
  0x3a   : > { %p1123_p4 = por %p1122_p1, %p1121_p2 }
  0x3c   : > { %p1124_p6 = pnand %p1123_p4, %p1117_p5 }
  0x3e   : > { %1127 = shalt.err (!%p1124_p6)
}
  0x3f   : > { %s1128_s5 = scalar_lea.vmem %s1356_s9, 384  ;;  %s1218_s6 = smov [#allocation6]  }
  0x40   : > { %p1129_p8 = scmp.ne.s32.totalorder %s1356_s9, %s1128_s5  ;;  %s1133_s7 = sshll.u32 %s1218_s6, 4  ;;  %s1134_s7 = int_to_ptr.vmem [resolvable:$false] %s1133_s7 }
  0x41   : > { %s1135_s26 = scalar_lea.vmem %s1134_s7, 768  ;;  %p1136_p3 = scmp.lt.s32.totalorder %s1356_s9, %s1134_s7 }
  0x42   : > { %p1131_p10 = pnand %p1129_p8, %p1115_p0  ;;  %p1137_p7 = scmp.lt.s32.totalorder %s1135_s26, %s1128_s5 }
  0x44   : > { %p1132_p11 = pneg %p1131_p10  ;;  %p1138_p9 = por %p1137_p7, %p1136_p3 }
  0x46   : > { %p1139_p2 = pnand %p1138_p9, %p1132_p11 }
  0x48   : > { %1142 = shalt.err (!%p1139_p2)
}
  0x49   : > { %1015 = dma.hbm_to_vmem [thread:$0]  (!%p1347_p13), %s1354_s29, 384, %s1356_s9, %s175_s10  }
  0x4a   : > { %p1638_p5 = scmp.ne.s32.totalorder %s1633_s24, 0 }
  0x4b   : > { %p1639_p0 = scmp.eq.s32.totalorder (!%p1638_p5), %s1271_s0, 0 }
  0x4c   : > { %195 = sbr.rel (%p1638_p5) target bundleno = 422 (0x1a6), region = 36 }
  0x53   : > { %1188 = dma.done.wait (%p1639_p0), [#allocation4], 3072   ;;  %p1640_p1 = pmov %p1639_p0 }
  0x54   : > { %s1390_s30 = sand.u32 1, %s1205_s18   ;;  %p1641_p13 = scmp.ne.s32.totalorder %s1631_s22, 0 }
  0x55   : > { %1190 = vsyncadd (%p1640_p1), [#allocation4], 4294964224  ;;  %s999_s8 = smul.u32 24, %s1390_s30  ;;  %s202_s27 = scalar_lea.sflag [#allocation7], %s1390_s30 }
  0x57   : > { %s1394_s11 = scalar_lea.vmem [#allocation6], %s999_s8 }
  0x58   : > { %1192 = dma.done.wait (%p1641_p13), %s202_s27, 384  }
  0x59   : > { %1194 = vsyncadd (%p1641_p13), %s202_s27, 4294966912  ;;  %v1219_v0 = vmov 0.0   ;;  %vm1220_vm0 = vmmov 0   ;;  %v1403_v1 = vld [vmem:[#allocation3 + $0x40] sm:$0xff]   ;;  %v1411_v4 = vld [vmem:[#allocation3 + $0x48] sm:$0xff]   ;;  %v236_v13 = vlaneseq  ;;  %s708_s29 = sld [smem:[#allocation2]] }
  0x5a   : > { %937 = vmatprep.subr.bf16.mxu1 %v1219_v0  ;;  %953 = vmatprep.mubr.msk.bf16.mxu1 %vm1220_vm0, %v1219_v0  ;;  %v1405_v2 = vld [vmem:[#allocation3] sm:$0xff]   ;;  %v1414_v5 = vld [vmem:[#allocation3 + $0x8] sm:$0xff]   ;;  %v1420_v7 = vld [vmem:[#allocation3 + $0x50] sm:$0xff]   ;;  %s815_s9 = sshll.u32 %s1390_s30, 3  ;;  %s841_s10 = sshll.u32 %s1271_s0, 7 }
  0x5b   : > { %844 = vmatprep.subr.bf16.mxu0 %v1403_v1  ;;  %v1408_v3 = vld [vmem:[#allocation3 + $0x80] sm:$0xff]   ;;  %v1418_v6 = vld [vmem:[#allocation3 + $0x88] sm:$0xff]   ;;  %v1423_v8 = vld [vmem:[#allocation3 + $0x10] sm:$0xff]   ;;  %v237_v17 = vshrl.u32 %v236_v13, 7  ;;  %s229_s12 = scalar_lea.vmem [#allocation8], %s815_s9  ;;  %s1579_s16 = scalar_lea.hbm %s1627_s4, %s841_s10 }
  0x5c   : > { %845 = vmatpush3.bf16.msra.mxu0 %v1405_v2  ;;  %938 = vmatpush3.bf16.msra.mxu1 %v1408_v3  ;;  %v1427_v9 = vld [vmem:[#allocation3 + $0x90] sm:$0xff]   ;;  %v1430_v10 = vld [vmem:[#allocation3 + $0x58] sm:$0xff]   ;;  %v1439_v14 = vld [vmem:[#allocation3 + $0x60] sm:$0xff]   ;;  %s726_s13 = sshll.u32 %s229_s12, 4  ;;  %s713_s5 = scalar_lea.sflag [#allocation5], %s1390_s30  ;;  %s1581_s13 = int_to_ptr.vmem [resolvable:$true] %s726_s13 }
  0x5d   : > { %846 = vmatprep.subr.bf16.mxu0 %v1411_v4  ;;  %939 = vmatprep.subr.bf16.mxu1 %v1219_v0  ;;  %v1432_v11 = vld [vmem:[#allocation3 + $0x18] sm:$0xff]   ;;  %v1442_v15 = vld [vmem:[#allocation3 + $0x20] sm:$0xff]   ;;  %v1449_v18 = vld [vmem:[#allocation3 + $0x68] sm:$0xff]   ;;  %v242_v21 = vsub.s32 1, %v237_v17  ;;  %v238_v23 = vsub.s32 0, %v237_v17  ;;  %v246_v25 = vsub.s32 2, %v237_v17 }
  0x5e   : > { %v1435_v12 = vld [vmem:[#allocation3 + $0x98] sm:$0xff]   ;;  %v1445_v16 = vld [vmem:[#allocation3 + $0xa0] sm:$0xff]   ;;  %v1452_v19 = vld [vmem:[#allocation3 + $0x28] sm:$0xff]   ;;  %s1143_s6 = scalar_lea.vmem %s1581_s13, 128  ;;  %s1221_s0 = smov [#allocation8]  }
  0x5f   : > { %v1455_v20 = vld [vmem:[#allocation3 + $0xa8] sm:$0xff]   ;;  %v1459_v22 = vld [vmem:[#allocation3 + $0x70] sm:$0xff]   ;;  %v1467_v27 = vld [vmem:[#allocation3 + $0x78] sm:$0xff]   ;;  %p1144_p4 = scmp.ne.s32.totalorder %s1581_s13, %s1143_s6  ;;  %s1147_s7 = sshll.u32 %s1221_s0, 4  ;;  %s1148_s7 = int_to_ptr.vmem [resolvable:$false] %s1147_s7 }
  0x60   : > { %847 = vmatpush3.bf16.msra.mxu0 %v1414_v5  ;;  %940 = vmatpush3.bf16.msra.mxu1 %v1418_v6  ;;  %v1462_v24 = vld [vmem:[#allocation3 + $0x30] sm:$0xff]   ;;  %v232_v28 = vld [vmem:[%s1394_s11 + $0x8] sm:$0xff]  ;;  %v231_v30 = vld [vmem:[%s1394_s11] sm:$0xff]  ;;  %s1149_s26 = scalar_lea.vmem %s1148_s7, 256  ;;  %p1150_p10 = scmp.lt.s32.totalorder %s1581_s13, %s1148_s7 }
  0x61   : > { %848 = vmatprep.subr.bf16.mxu0 %v1420_v7  ;;  %941 = vmatprep.subr.bf16.mxu1 %v1219_v0  ;;  %v1464_v26 = vld [vmem:[#allocation3 + $0xb0] sm:$0xff]   ;;  %v234_v29 = vld [vmem:[%s1624_s1] sm:$0x7]  ;;  %v1479_v35 = vld [vmem:[#allocation3 + $0x38] sm:$0xff]   ;;  %p1145_p6 = pnand %p1144_p4, %p1341_p12  ;;  %p1151_p11 = scmp.lt.s32.totalorder %s1149_s26, %s1143_s6 }
  0x62   : > { %v243_v31 = vrot.slane %v234_v29, %v242_v21  ;;  %v239_v32 = vrot.slane %v234_v29, %v238_v23  ;;  %v233_v33 = vld [vmem:[%s1394_s11 + $0x10] sm:$0xff]  ;;  %v247_v34 = vrot.slane %v234_v29, %v246_v25  ;;  %v1483_v39 = vld [vmem:[#allocation3 + $0xb8] sm:$0xff]  }
  0x63   : > { %p1146_p8 = pneg %p1145_p6  ;;  %p1152_p3 = por %p1151_p11, %p1150_p10 }
  0x64   : > { %849 = vmatpush3.bf16.msra.mxu0 %v1423_v8  ;;  %942 = vmatpush3.bf16.msra.mxu1 %v1427_v9  ;;  %v252_v36 = vmul.f32 %v243_v31, %v232_v28  ;;  %v251_v37 = vmul.f32 %v239_v32, %v231_v30  ;;  %v253_v38 = vmul.f32 %v247_v34, %v233_v33  ;;  %v709_v28 = vstv %s708_s29 }
  0x65   : > { %850 = vmatprep.subr.bf16.mxu0 %v1430_v10  ;;  %943 = vmatprep.subr.bf16.mxu1 %v1219_v0  ;;  %p1153_p7 = pnand %p1152_p3, %p1146_p8 }
  0x66   : > { %v255_v40 = vpack.c.bf16 %v252_v36, %v252_v36  ;;  %v254_v41 = vpack.c.bf16 %v251_v37, %v251_v37  ;;  %v256_v42 = vpack.c.bf16 %v253_v38, %v253_v38 }
  0x68   : > { %851 = vmatpush3.bf16.msra.mxu0 %v1432_v11  ;;  %944 = vmatpush3.bf16.msra.mxu1 %v1435_v12  ;;  %v258_v43 = vunpack.c.l.bf16 %v255_v40  ;;  %v257_v44 = vunpack.c.l.bf16 %v254_v41  ;;  %v259_v45 = vunpack.c.l.bf16 %v256_v42 }
  0x69   : > { %852 = vmatprep.subr.bf16.mxu0 %v1439_v14  ;;  %945 = vmatprep.subr.bf16.mxu1 %v1219_v0 }
  0x6a   : > { %v261_v46 = vsub.f32 %v252_v36, %v258_v43  ;;  %v1489_v47 = vsub.f32 %v251_v37, %v257_v44  ;;  %v1492_v48 = vsub.f32 %v253_v38, %v259_v45 }
  0x6c   : > { %853 = vmatpush3.bf16.msra.mxu0 %v1442_v15  ;;  %946 = vmatpush3.bf16.msra.mxu1 %v1445_v16  ;;  %v264_v49 = vpack.c.bf16 %v261_v46, %v261_v46  ;;  %v1496_v50 = vpack.c.bf16 %v1489_v47, %v1489_v47  ;;  %v1500_v51 = vpack.c.bf16 %v1492_v48, %v1492_v48 }
  0x6d   : > { %854 = vmatprep.subr.bf16.mxu0 %v1449_v18  ;;  %947 = vmatprep.subr.bf16.mxu1 %v1219_v0 }
  0x6e   : > { %499 = vmatprep.mubr.bf16.mxu0 %v264_v49  ;;  %v267_v52 = vunpack.c.l.bf16 %v264_v49  ;;  %v268_v55 = vunpack.c.l.bf16 %v1500_v51  ;;  %v266_v56 = vunpack.c.l.bf16 %v1496_v50 }
  0x70   : > { %855 = vmatpush3.bf16.msra.mxu0 %v1452_v19  ;;  %948 = vmatpush3.bf16.msra.mxu1 %v1455_v20  ;;  %v270_v53 = vsub.f32 %v261_v46, %v267_v52  ;;  %v271_v57 = vsub.f32 %v1492_v48, %v268_v55  ;;  %v269_v58 = vsub.f32 %v1489_v47, %v266_v56 }
  0x71   : > { %856 = vmatprep.subr.bf16.mxu0 %v1459_v22  ;;  %949 = vmatprep.subr.bf16.mxu1 %v1219_v0 }
  0x72   : > { %v273_v54 = vpack.c.bf16 %v270_v53, %v270_v53  ;;  %v274_v59 = vpack.c.bf16 %v271_v57, %v271_v57  ;;  %v272_v60 = vpack.c.bf16 %v269_v58, %v269_v58 }
  0x74   : > { %857 = vmatpush3.bf16.msra.mxu0 %v1462_v24  ;;  %950 = vmatpush3.bf16.msra.mxu1 %v1464_v26 }
  0x75   : > { %858 = vmatprep.subr.bf16.mxu0 %v1467_v27  ;;  %951 = vmatprep.subr.bf16.mxu1 %v1219_v0 }
  0x78   : > { %859 = vmatpush3.bf16.msra.mxu0 %v1479_v35  ;;  %952 = vmatpush3.bf16.msra.mxu1 %v1483_v39 }
  0x79   : > { %875 = vmatprep.subr.bf16.mxu0 %v1403_v1  ;;  %957 = vmatprep.subr.bf16.mxu1 %v1219_v0 }
  0x7b   : > { %954 = vmatmul.mubr.bf16.vlgmr.msra.gmra.mrb[0].mxu1 %v1500_v51  ;;  %500 = vmatmul.mubr.bf16.vlgmr.msra.gmra.mrb[0].mxu0 %v1496_v50 }
  0x7c   : > { %958 = vmatpush3.bf16.msra.mxu1 %v1408_v3  ;;  %876 = vmatpush3.bf16.msra.mxu0 %v1405_v2 }
  0x7d   : > { %959 = vmatprep.subr.bf16.mxu1 %v1219_v0  ;;  %877 = vmatprep.subr.bf16.mxu0 %v1411_v4 }
  0x7e   : > { %579 = vmatprep.mubr.bf16.mxu0 %v255_v40  ;;  %973 = vmatprep.mubr.msk.bf16.mxu1 %vm1220_vm0, %v1219_v0 }
  0x80   : > { %960 = vmatpush3.bf16.msra.mxu1 %v1418_v6  ;;  %878 = vmatpush3.bf16.msra.mxu0 %v1414_v5 }
  0x81   : > { %961 = vmatprep.subr.bf16.mxu1 %v1219_v0  ;;  %879 = vmatprep.subr.bf16.mxu0 %v1420_v7 }
  0x84   : > { %962 = vmatpush3.bf16.msra.mxu1 %v1427_v9  ;;  %880 = vmatpush3.bf16.msra.mxu0 %v1423_v8 }
  0x85   : > { %963 = vmatprep.subr.bf16.mxu1 %v1219_v0  ;;  %881 = vmatprep.subr.bf16.mxu0 %v1430_v10 }
  0x88   : > { %964 = vmatpush3.bf16.msra.mxu1 %v1435_v12  ;;  %882 = vmatpush3.bf16.msra.mxu0 %v1432_v11 }
  0x89   : > { %965 = vmatprep.subr.bf16.mxu1 %v1219_v0  ;;  %883 = vmatprep.subr.bf16.mxu0 %v1439_v14 }
  0x8c   : > { %966 = vmatpush3.bf16.msra.mxu1 %v1445_v16  ;;  %884 = vmatpush3.bf16.msra.mxu0 %v1442_v15 }
  0x8d   : > { %967 = vmatprep.subr.bf16.mxu1 %v1219_v0  ;;  %885 = vmatprep.subr.bf16.mxu0 %v1449_v18 }
  0x90   : > { %968 = vmatpush3.bf16.msra.mxu1 %v1455_v20  ;;  %886 = vmatpush3.bf16.msra.mxu0 %v1452_v19 }
  0x91   : > { %969 = vmatprep.subr.bf16.mxu1 %v1219_v0  ;;  %887 = vmatprep.subr.bf16.mxu0 %v1459_v22 }
  0x94   : > { %970 = vmatpush3.bf16.msra.mxu1 %v1464_v26  ;;  %888 = vmatpush3.bf16.msra.mxu0 %v1462_v24 }
  0x95   : > { %971 = vmatprep.subr.bf16.mxu1 %v1219_v0  ;;  %889 = vmatprep.subr.bf16.mxu0 %v1467_v27 }
  0x98   : > { %972 = vmatpush3.bf16.msra.mxu1 %v1483_v39  ;;  %890 = vmatpush3.bf16.msra.mxu0 %v1479_v35 }
  0x99   : > { %977 = vmatprep.subr.bf16.mxu1 %v1219_v0  ;;  %906 = vmatprep.subr.bf16.mxu0 %v1403_v1 }
  0x9b   : > { %974 = vmatmul.mubr.bf16.vlgmr.msra.gmra.mrb[4].mxu1 %v256_v42  ;;  %580 = vmatmul.mubr.bf16.vlgmr.msra.gmra.mrb[4].mxu0 %v254_v41 }
  0x9c   : > { %978 = vmatpush3.bf16.msra.mxu1 %v1408_v3  ;;  %907 = vmatpush3.bf16.msra.mxu0 %v1405_v2 }
  0x9d   : > { %979 = vmatprep.subr.bf16.mxu1 %v1219_v0  ;;  %908 = vmatprep.subr.bf16.mxu0 %v1411_v4 }
  0x9e   : > { %659 = vmatprep.mubr.bf16.mxu0 %v273_v54  ;;  %993 = vmatprep.mubr.msk.bf16.mxu1 %vm1220_vm0, %v1219_v0 }
  0xa0   : > { %980 = vmatpush3.bf16.msra.mxu1 %v1418_v6  ;;  %909 = vmatpush3.bf16.msra.mxu0 %v1414_v5 }
  0xa1   : > { %981 = vmatprep.subr.bf16.mxu1 %v1219_v0  ;;  %910 = vmatprep.subr.bf16.mxu0 %v1420_v7 }
  0xa4   : > { %982 = vmatpush3.bf16.msra.mxu1 %v1427_v9  ;;  %911 = vmatpush3.bf16.msra.mxu0 %v1423_v8 }
  0xa5   : > { %983 = vmatprep.subr.bf16.mxu1 %v1219_v0  ;;  %912 = vmatprep.subr.bf16.mxu0 %v1430_v10 }
  0xa8   : > { %984 = vmatpush3.bf16.msra.mxu1 %v1435_v12  ;;  %913 = vmatpush3.bf16.msra.mxu0 %v1432_v11 }
  0xa9   : > { %985 = vmatprep.subr.bf16.mxu1 %v1219_v0  ;;  %914 = vmatprep.subr.bf16.mxu0 %v1439_v14 }
  0xac   : > { %986 = vmatpush3.bf16.msra.mxu1 %v1445_v16  ;;  %915 = vmatpush3.bf16.msra.mxu0 %v1442_v15 }
  0xad   : > { %987 = vmatprep.subr.bf16.mxu1 %v1219_v0  ;;  %916 = vmatprep.subr.bf16.mxu0 %v1449_v18 }
  0xb0   : > { %988 = vmatpush3.bf16.msra.mxu1 %v1455_v20  ;;  %917 = vmatpush3.bf16.msra.mxu0 %v1452_v19 }
  0xb1   : > { %989 = vmatprep.subr.bf16.mxu1 %v1219_v0  ;;  %918 = vmatprep.subr.bf16.mxu0 %v1459_v22 }
  0xb4   : > { %990 = vmatpush3.bf16.msra.mxu1 %v1464_v26  ;;  %919 = vmatpush3.bf16.msra.mxu0 %v1462_v24 }
  0xb5   : > { %991 = vmatprep.subr.bf16.mxu1 %v1219_v0  ;;  %920 = vmatprep.subr.bf16.mxu0 %v1467_v27 }
  0xb8   : > { %992 = vmatpush3.bf16.msra.mxu1 %v1483_v39  ;;  %921 = vmatpush3.bf16.msra.mxu0 %v1479_v35 }
  0xbb   : > { %994 = vmatmul.mubr.bf16.vlgmr.msra.gmra.mrb[8].mxu1 %v274_v59  ;;  %660 = vmatmul.mubr.bf16.vlgmr.msra.gmra.mrb[8].mxu0 %v272_v60 }
 0x14e   : > { %v541_v61 = vpop.f32.mrb[0].mxu1  ;;  %v860_v62 = vpop.f32.mrb[0].mxu0 }
 0x14f   : > { %v955_v63 = vpop.f32.mrb[1].mxu1  ;;  %v861_v1 = vpop.f32.mrb[1].mxu0 }
 0x150   : > { %v544_v2 = vpop.f32.mrb[2].mxu1  ;;  %v862_v3 = vadd.f32 %v861_v1, %v860_v62  ;;  %v863_v4 = vpop.f32.mrb[2].mxu0 }
 0x151   : > { %v956_v5 = vpop.f32.mrb[3].mxu1  ;;  %v864_v0 = vpop.f32.mrb[3].mxu0 }
 0x152   : > { %v542_v6 = vadd.f32 %v862_v3, %v541_v61 }
 0x16e   : > { %v621_v7 = vpop.f32.mrb[4].mxu1  ;;  %v891_v8 = vpop.f32.mrb[4].mxu0 }
 0x16f   : > { %v975_v9 = vpop.f32.mrb[5].mxu1  ;;  %v892_v10 = vpop.f32.mrb[5].mxu0 }
 0x170   : > { %v624_v11 = vpop.f32.mrb[6].mxu1  ;;  %v893_v12 = vadd.f32 %v892_v10, %v891_v8  ;;  %v894_v13 = vpop.f32.mrb[6].mxu0 }
 0x171   : > { %v976_v14 = vpop.f32.mrb[7].mxu1  ;;  %v895_v15 = vpop.f32.mrb[7].mxu0 }
 0x172   : > { %v582_v16 = vadd.f32 %v893_v12, %v542_v6 }
 0x174   : > { %v622_v17 = vadd.f32 %v621_v7, %v582_v16 }
 0x18e   : > { %v701_v18 = vpop.f32.mrb[8].mxu1  ;;  %v922_v19 = vpop.f32.mrb[8].mxu0 }
 0x18f   : > { %v995_v20 = vpop.f32.mrb[9].mxu1  ;;  %v923_v21 = vpop.f32.mrb[9].mxu0 }
 0x190   : > { %v704_v22 = vpop.f32.mrb[10].mxu1  ;;  %v924_v23 = vadd.f32 %v923_v21, %v922_v19  ;;  %v925_v24 = vpop.f32.mrb[10].mxu0 }
 0x191   : > { %v996_v25 = vpop.f32.mrb[11].mxu1  ;;  %v926_v26 = vpop.f32.mrb[11].mxu0 }
 0x192   : > { %v702_v27 = vadd.f32 %v924_v23, %v701_v18 }
 0x194   : > { %v707_v29 = vadd.f32 %v702_v27, %v622_v17 }
 0x196   : > { %v710_v30 = vadd.f32 %v709_v28, %v707_v29 }
 0x198   : > { %711 = vst [vmem:[%s229_s12] sm:$0xff] %v710_v30 }
 0x199   : > { %1156 = shalt.err (!%p1153_p7)
}
 0x19a   : > { %s1157_s30 = scalar_lea.hbm %s1579_s16, 128  ;;  %s1161_s11 = scalar_lea.hbm %s1627_s4, 256 }
 0x19b   : > { %p1158_p9 = scmp.ne.s32.totalorder %s1579_s16, %s1157_s30  ;;  %p1162_p0 = scmp.lt.u32.totalorder %s1579_s16, %s1627_s4 }
 0x19c   : > { %p1163_p1 = scmp.lt.u32.totalorder %s1161_s11, %s1157_s30  ;;  %p1165_p4 = scmp.lt.u32.totalorder %s1157_s30, %s1579_s16 }
 0x19d   : > { %p1159_p2 = pnand %p1158_p9, %p1341_p12 }
 0x19e   : > { %p1164_p13 = por %p1163_p1, %p1162_p0 }
 0x19f   : > { %p1160_p5 = pneg %p1159_p2 }
 0x1a0   : > { %p1166_p6 = por %p1165_p4, %p1164_p13 }
 0x1a2   : > { %p1167_p8 = pnand %p1166_p6, %p1160_p5 }
 0x1a4   : > { %1170 = shalt.err (!%p1167_p8)
}
 0x1a5   : > { %1006 = dma.vmem_to_hbm [thread:$0]  (%p1341_p12), %s1581_s13, 128, %s1579_s16, %s713_s5  }
 0x1a6 PF: > { %s738_s29 = sand.u32 1, %s1201_s17   ;;  %p1642_p10 = scmp.ne.s32.totalorder %s1632_s23, 0 }
 0x1a7   : > { %p1643_p11 = scmp.ge.s32.totalorder %s1213_s20, 2  ;;  %s739_s9 = scalar_lea.sflag [#allocation5], %s738_s29 }
 0x1a9   : > { %p1017_p3 = pnand %p1643_p11, %p1642_p10 }
 0x1ab   : > { %1196 = dma.done.wait (!%p1017_p3), %s739_s9, 128  }
 0x1ac   : > { %1198 = vsyncadd (!%p1017_p3), %s739_s9, 4294967168  ;;  %p19_p7 = scmp.ge.s32.totalorder %s1306_s28, 4   ;;  %s1644_s17 = smov %s1205_s18 }
 0x1ad   : > { %s1645_s18 = smov %s1209_s19  ;;  %s1646_s19 = smov %s1337_s21 }
 0x1ae   : > { %s1647_s20 = smov %s1306_s28  ;;  %21 = sbr.rel (!%p19_p7) target bundleno = 8 (0x8), region = 86 }
 0x1b5   :  { %744 = vsyncpa [#allocation4], 1 }
 0x1b6   :  { %746 = vsyncpa [#allocation4 + $0x1], 1 }
 0x1b7   :  { %747 = vsyncpa [#allocation7], 1 }
 0x1b8   :  { %749 = vsyncpa [#allocation7 + $0x1], 1 }
 0x1b9   :  { %750 = vsyncpa [#allocation5], 1 }
 0x1ba   :  { %752 = vsyncpa [#allocation5 + $0x1], 1 }

</bundles_post_ra>
